<compile_context>
chip_gen: v7x
topology: tpu7x:2x2x1
jax: 0.10.0
libtpu: 0.0.40
codegen_flags: <defaults>
</compile_context>

<pallas_src>
import math

import jax
import jax.numpy as jnp
from jax.experimental import pallas as pl
from jax.experimental.pallas import tpu as pltpu


def _round_up(v, m):
    return (v + m - 1) // m * m


def _bert_intermediate_kernel(x_ref, w_ref, b_ref, o_ref):
    # x_ref: [tm, H] (compute dtype), w_ref: [H, tn] (compute dtype),
    # b_ref: [1, I_pad] f32 (resident), o_ref: [tm, tn] (output dtype).
    j = pl.program_id(1)
    tn = o_ref.shape[-1]

    # MXU matmul with f32 accumulation.
    y = jnp.dot(x_ref[...], w_ref[...], preferred_element_type=jnp.float32)

    # Slice this N-tile's bias out of the resident full-bias block.
    off = pl.multiple_of(j * tn, 128)
    bias = b_ref[:, pl.ds(off, tn)].astype(jnp.float32)  # (1, tn)
    y = y + bias

    # Exact GELU: 0.5 * y * (1 + erf(y / sqrt(2)))  (matches torch F.gelu).
    inv_sqrt2 = jnp.float32(1.0 / math.sqrt(2.0))
    y = 0.5 * y * (1.0 + jax.lax.erf(y * inv_sqrt2))

    # TODO(synk): dropout omitted (inference / eval mode => identity).
    o_ref[...] = y.astype(o_ref.dtype)


def bert_intermediate(x, w, b, *, tm=512, tn=512, compute_dtype=jnp.bfloat16):
    """x: [B, S, H], w: [H, I] (transpose of PyTorch's [I, H]), b: [I].

    Returns GELU(x @ w + b) with shape [B, S, I] in x.dtype.
    """
    B, S, H = x.shape
    Hw, I = w.shape
    assert Hw == H, "weight must be [H, I]"
    M = B * S
    out_dtype = x.dtype

    # Effective tiles: multiples of (8, 128), clamped to the padded problem.
    tn_eff = min(_round_up(tn, 128), _round_up(I, 128))
    tm_eff = min(_round_up(tm, 8), _round_up(M, 8))
    M_pad = _round_up(M, tm_eff)
    I_pad = _round_up(I, tn_eff)

    # Cast matmul operands to the (bf16) compute dtype; bias stays f32.
    x2d = x.reshape(M, H).astype(compute_dtype)
    wc = w.astype(compute_dtype)
    b2d = b.astype(jnp.float32).reshape(1, I)

    if M_pad != M:
        x2d = jnp.pad(x2d, ((0, M_pad - M), (0, 0)))
    if I_pad != I:
        wc = jnp.pad(wc, ((0, 0), (0, I_pad - I)))
        b2d = jnp.pad(b2d, ((0, 0), (0, I_pad - I)))

    grid = (M_pad // tm_eff, I_pad // tn_eff)  # N innermost -> x tile resident

    in_sz = jnp.dtype(compute_dtype).itemsize
    out_sz = jnp.dtype(out_dtype).itemsize

    # Explicit VMEM budget: double-buffered tiles + resident bias + margin,
    # capped well under v7x's 64 MiB/TC.
    vmem_needed = 2 * (tm_eff * H * in_sz
                       + H * tn_eff * in_sz
                       + I_pad * 4
                       + tm_eff * tn_eff * out_sz)
    vmem_limit = int(min(max(2 * vmem_needed, 16 * 1024 * 1024),
                         48 * 1024 * 1024))

    cost = pl.CostEstimate(
        flops=2 * M * H * I,
        transcendentals=M * I,
        bytes_accessed=(M * H * in_sz + H * I * in_sz + I * 4 + M * I * out_sz),
    )

    out = pl.pallas_call(
        _bert_intermediate_kernel,
        out_shape=jax.ShapeDtypeStruct((M_pad, I_pad), out_dtype),
        grid_spec=pltpu.PrefetchScalarGridSpec(
            num_scalar_prefetch=0,
            grid=grid,
            in_specs=[
                # Activation row tile: constant across the inner N loop.
                pl.BlockSpec((tm_eff, H), lambda i, j: (i, 0)),
                # Weight column tile: streams along the inner N loop.
                pl.BlockSpec((H, tn_eff), lambda i, j: (0, j)),
                # Full bias, loaded once and kept resident.
                pl.BlockSpec((1, I_pad), lambda i, j: (0, 0)),
            ],
            out_specs=pl.BlockSpec((tm_eff, tn_eff), lambda i, j: (i, j)),
        ),
        compiler_params=pltpu.CompilerParams(
            dimension_semantics=("parallel", "parallel"),
            vmem_limit_bytes=vmem_limit,
        ),
        cost_estimate=cost,
    )(x2d, wc, b2d)

    out = out[:M, :I]
    return out.reshape(B, S, I)


def _reference(x, w, b, compute_dtype):
    # Same bf16-operand / f32-accumulate recipe as the kernel.
    y = jnp.einsum("bsh,hi->bsi",
                   x.astype(compute_dtype), w.astype(compute_dtype),
                   preferred_element_type=jnp.float32)
    y = y + b.astype(jnp.float32)
    y = 0.5 * y * (1.0 + jax.lax.erf(y * jnp.float32(1.0 / math.sqrt(2.0))))
    return y.astype(x.dtype)


def _reference_f32(x, w, b):
    y = jnp.einsum("bsh,hi->bsi", x, w) + b
    return 0.5 * y * (1.0 + jax.lax.erf(y / jnp.sqrt(2.0)))


if __name__ == "__main__":
    # Small, BERT-like shapes: batch=2, seq=8, hidden=32, intermediate=256.
    B, S, H, I = 2, 8, 32, 256

    key = jax.random.PRNGKey(0)
    kx, kw, kb = jax.random.split(key, 3)

    x = jax.random.normal(kx, (B, S, H), dtype=jnp.float32)
    # Deterministic "nn.Linear"-style init (synthetic, not a checkpoint load).
    bound = 1.0 / math.sqrt(H)
    w = jax.random.uniform(kw, (H, I), minval=-bound, maxval=bound,
                           dtype=jnp.float32)
    b = jax.random.uniform(kb, (I,), minval=-bound, maxval=bound,
                           dtype=jnp.float32)

    out = bert_intermediate(x, w, b)
    out = jax.block_until_ready(out)

    assert out.shape == (B, S, I)
    # Tight check vs a reference using the same bf16-operand recipe.
    ref = _reference(x, w, b, jnp.bfloat16)
    assert jnp.allclose(out, ref, atol=2e-3, rtol=2e-3), "mismatch vs bf16 reference"
    # Loose sanity check vs full-f32 math (bounds bf16 input-rounding error).
    ref32 = _reference_f32(x, w, b)
    assert jnp.allclose(out, ref32, atol=3e-2, rtol=3e-2), "mismatch vs f32 reference"

    print("KERNEL_OK")
</pallas_src>

<mosaic_0001>
module attributes {stable_mosaic.version = 11 : i64} {
  func.func @_bert_intermediate_kernel(%arg0: i32, %arg1: i32, %arg2: memref<16x32xbf16, #tpu.memory_space<vmem>>, %arg3: memref<32x256xbf16, #tpu.memory_space<vmem>>, %arg4: memref<1x256xf32, #tpu.memory_space<vmem>>, %arg5: memref<16x256xf32, #tpu.memory_space<vmem>>) attributes {dimension_semantics = [#tpu.dimension_semantics<parallel>, #tpu.dimension_semantics<parallel>], iteration_bounds = array<i64: 1, 1>, scalar_prefetch = 0 : i64, scratch_operands = 0 : i64, tpu.core_type = #tpu.core_type<tc>, window_params = [{transform_indices = @transform_0, window_bounds = array<i64: 16, 32>}, {transform_indices = @transform_1, window_bounds = array<i64: 32, 256>}, {pipeline_mode = #tpu.pipeline_mode<synchronous>, transform_indices = @transform_2, window_bounds = array<i64: 1, 256>}, {transform_indices = @transform_3, window_bounds = array<i64: 16, 256>}]} {
    %c0 = arith.constant 0 : index
    %c0_0 = arith.constant 0 : index
    %0 = vector.load %arg2[%c0, %c0_0] : memref<16x32xbf16, #tpu.memory_space<vmem>>, vector<16x32xbf16>
    %c0_1 = arith.constant 0 : index
    %c0_2 = arith.constant 0 : index
    %1 = vector.load %arg3[%c0_1, %c0_2] : memref<32x256xbf16, #tpu.memory_space<vmem>>, vector<32x256xbf16>
    %cst = arith.constant dense<0.000000e+00> : vector<16x256xf32>
    %2 = tpu.matmul %0, %1, %cst {dimension_numbers = #tpu.dot_dimension_numbers<[1], [0], [0], [1], [0, 0, 1, 1], [], []>} : vector<16x32xbf16>, vector<32x256xbf16>, vector<16x256xf32> -> vector<16x256xf32>
    %c256_i32 = arith.constant 256 : i32
    %3 = arith.muli %arg1, %c256_i32 : i32
    %4 = tpu.assume_multiple %3, 128 : i32
    %c0_3 = arith.constant 0 : index
    %5 = arith.index_cast %4 : i32 to index
    %6 = vector.load %arg4[%c0_3, %5] : memref<1x256xf32, #tpu.memory_space<vmem>>, vector<1x256xf32>
    %7 = vector.broadcast %6 : vector<1x256xf32> to vector<16x256xf32>
    %8 = arith.addf %2, %7 : vector<16x256xf32>
    %cst_4 = arith.constant 5.000000e-01 : f32
    %9 = vector.broadcast %cst_4 : f32 to vector<16x256xf32>
    %10 = arith.mulf %9, %8 : vector<16x256xf32>
    %cst_5 = arith.constant 0.707106769 : f32
    %11 = vector.broadcast %cst_5 : f32 to vector<16x256xf32>
    %12 = arith.mulf %8, %11 : vector<16x256xf32>
    %13 = math.erf %12 : vector<16x256xf32>
    %cst_6 = arith.constant 1.000000e+00 : f32
    %14 = vector.broadcast %cst_6 : f32 to vector<16x256xf32>
    %15 = arith.addf %14, %13 : vector<16x256xf32>
    %16 = arith.mulf %10, %15 : vector<16x256xf32>
    %c0_7 = arith.constant 0 : index
    %c0_8 = arith.constant 0 : index
    %17 = vector.load %arg5[%c0_7, %c0_8] : memref<16x256xf32, #tpu.memory_space<vmem>>, vector<16x256xf32>
    tpu.vector_store %arg5[%c0_7, %c0_8], %16 {strides = array<i32>} : memref<16x256xf32, #tpu.memory_space<vmem>>, vector<16x256xf32>,
    return
  }
  func.func @transform_0(%arg0: i32, %arg1: i32) -> (i32, i32) {
    %c0_i32 = arith.constant 0 : i32
    %c0_i32_0 = arith.constant 0 : i32
    return %arg0, %c0_i32 : i32, i32
  }
  func.func @transform_1(%arg0: i32, %arg1: i32) -> (i32, i32) {
    %c0_i32 = arith.constant 0 : i32
    %c0_i32_0 = arith.constant 0 : i32
    return %c0_i32, %arg1 : i32, i32
  }
  func.func @transform_2(%arg0: i32, %arg1: i32) -> (i32, i32) {
    %c0_i32 = arith.constant 0 : i32
    %c0_i32_0 = arith.constant 0 : i32
    %c0_i32_1 = arith.constant 0 : i32
    return %c0_i32, %c0_i32_0 : i32, i32
  }
  func.func @transform_3(%arg0: i32, %arg1: i32) -> (i32, i32) {
    %c0_i32 = arith.constant 0 : i32
    return %arg0, %arg1 : i32, i32
  }
}

</mosaic_0001>

<bundles_post_ra>
// kernel: tpu_custom_call.1
= control target key start
LH: loop header
LB: loop body
LE: loop exit
PB: predicated region body
PF: predicated region fallthrough
CT: control target
= control target key end

     0   :  { %8 = vsyncpa [#allocation3], 0  ;;  %s353_s0 = inlined_call_operand.hbm [shape: bf16[16,32], index: 0, kind: input, shape index: {}]   ;;  %s354_s1 = inlined_call_operand.hbm [shape: bf16[32,256], index: 1, kind: input, shape index: {}]   ;;  %s355_s2 = inlined_call_operand.vmem [shape: f32[1,256], index: 2, kind: input, shape index: {}]   ;;  %s356_s3 = inlined_call_operand.hbm [shape: f32[16,256], index: 3, kind: output, shape index: {}]  }
   0x1   :  { %9 = vsyncpa [#allocation6], 0 }
   0x2   :  { %10 = vsyncpa [#allocation4], 0  ;;  %s284_s12 = smov [#allocation2]   ;;  %s212_s16 = scalar_lea.hbm %s353_s0, 128 }
   0x3   :  { %s16_s13 = sshll.u32 %s284_s12, 4  ;;  %p213_p0 = scmp.ne.s32.totalorder %s353_s0, %s212_s16  ;;  %s17_s13 = int_to_ptr.vmem [resolvable:$true] %s16_s13 }
   0x4   :  { %p216_p1 = scmp.lt.u32.totalorder %s212_s16, %s353_s0 }
   0x6   :  { %p218_p2 = pnand %p216_p1, %p213_p0 }
   0x8   :  { %221 = shalt.err (!%p218_p2)
}
   0x9   :  { %s222_s21 = scalar_lea.vmem %s17_s13, 128  ;;  %p227_p4 = scmp.lt.s32.totalorder %s17_s13, %s17_s13 }
   0xa   :  { %p223_p3 = scmp.ne.s32.totalorder %s17_s13, %s222_s21  ;;  %p228_p5 = scmp.lt.s32.totalorder %s222_s21, %s222_s21 }
   0xc   :  { %p229_p6 = por %p228_p5, %p227_p4 }
   0xe   :  { %p230_p7 = pnand %p229_p6, %p223_p3 }
  0x10   :  { %233 = shalt.err (!%p230_p7)
}
  0x11   :  { %s285_s22 = smov 64   ;;  %s286_s23 = smov 4  }
  0x12   :  { %22 = dma.hbm_to_vmem [thread:$0]  %s353_s0, 128, %s17_s13, [#allocation3], %s285_s22, %s285_s22, %s286_s23  }
  0x13   :  { %s287_s26 = smov [#allocation5]   ;;  %s234_s30 = scalar_lea.hbm %s354_s1, 512 }
  0x14   :  { %s28_s27 = sshll.u32 %s287_s26, 4  ;;  %p235_p8 = scmp.ne.s32.totalorder %s354_s1, %s234_s30  ;;  %s29_s27 = int_to_ptr.vmem [resolvable:$true] %s28_s27 }
  0x15   :  { %p238_p9 = scmp.lt.u32.totalorder %s234_s30, %s354_s1 }
  0x17   :  { %p240_p10 = pnand %p238_p9, %p235_p8 }
  0x19   :  { %243 = shalt.err (!%p240_p10)
}
  0x1a   :  { %s244_s8 = scalar_lea.vmem %s29_s27, 512  ;;  %p249_p12 = scmp.lt.s32.totalorder %s29_s27, %s29_s27 }
  0x1b   :  { %p245_p11 = scmp.ne.s32.totalorder %s29_s27, %s244_s8  ;;  %p250_p13 = scmp.lt.s32.totalorder %s244_s8, %s244_s8 }
  0x1d   :  { %p251_p0 = por %p250_p13, %p249_p12 }
  0x1f   :  { %p252_p1 = pnand %p251_p0, %p245_p11 }
  0x21   :  { %255 = shalt.err (!%p252_p1)
}
  0x22   :  { %s288_s0 = smov 128   ;;  %s289_s9 = smov 8  }
  0x23   :  { %34 = dma.hbm_to_vmem [thread:$0]  %s354_s1, 512, %s29_s27, [#allocation6], %s288_s0, %s288_s0, %s289_s9  }
  0x24   :  { %278 = dma.done.wait [#allocation3], 128  }
  0x25   :  { %279 = vsyncadd [#allocation3], 4294967168 }
  0x26   :  { %280 = dma.done.wait [#allocation6], 512  }
  0x27   :  { %281 = vsyncadd [#allocation6], 4294966784  ;;  %v290_v0 = vmov 0   ;;  %v197_v1 = vld [vmem:[#allocation5 + $0x4] ss:$8 sps:$4 sm:$0xff]   ;;  %v203_v5 = vld [vmem:[#allocation2] sm:$0xff]   ;;  %v56_v6 = vlaneseq }
  0x28   :  { %127 = vmatprep.mubr.bf16.mxu0 %v290_v0  ;;  %v199_v2 = vld [vmem:[#allocation5] ss:$8 sps:$4 sm:$0xff]   ;;  %95 = vmatprep.subr.bf16.mxu0 %v197_v1  ;;  %v200_v3 = vld [vmem:[#allocation5 + $0x14] ss:$8 sps:$4 sm:$0xff]   ;;  %v202_v4 = vld [vmem:[#allocation5 + $0x10] ss:$8 sps:$4 sm:$0xff]  }
  0x29   :  { %96 = vmatpush1.bf16.msra.mxu0 %v199_v2  ;;  %vm91_vm0 = vcmask 261120   ;;  %v57_v7 = vshrl.u32 %v56_v6, 7  ;;  %v54_v9 = vld [vmem:[%s355_s2] sm:$0x3]  ;;  %s291_s2 = smov [#allocation7]  }
  0x2a   :  { %97 = vmatprep.subr.bf16.mxu0 %v200_v3  ;;  %s167_s13 = sshll.u32 %s291_s2, 4  ;;  %s168_s13 = int_to_ptr.vmem [resolvable:$true] %s167_s13 }
  0x2b   :  { %v58_v8 = vsub.s32 0, %v57_v7  ;;  %v62_v10 = vsub.s32 1, %v57_v7  ;;  %s256_s14 = scalar_lea.vmem %s168_s13, 512  ;;  %p261_p3 = scmp.lt.s32.totalorder %s168_s13, %s168_s13 }
  0x2c   :  { %p257_p2 = scmp.ne.s32.totalorder %s168_s13, %s256_s14  ;;  %p262_p4 = scmp.lt.s32.totalorder %s256_s14, %s256_s14 }
  0x2d   :  { %98 = vmatpush1.bf16.msra.mxu0 %v202_v4  ;;  %v59_v11 = vrot.slane %v54_v9, %v58_v8  ;;  %v63_v12 = vrot.slane %v54_v9, %v62_v10 }
  0x2e   :  { %p263_p5 = por %p262_p4, %p261_p3 }
  0x30   :  { %186 = vmatmul.mubr.msk.bf16.vlgmr.msra.gmra.mrb[0].mxu0 %vm91_vm0, %v203_v5  ;;  %p264_p6 = pnand %p263_p5, %p257_p2 }
 0x103   :  { %v129_v13 = vpop.f32.mrb[0].mxu0 }
 0x104   :  { %v130_v14 = vadd.f32 %v129_v13, %v59_v11  ;;  %v131_v15 = vpop.f32.mrb[1].mxu0 }
 0x105   :  { %v132_v16 = vadd.f32 %v131_v15, %v63_v12  ;;  %v133_v17 = vpop.f32.mrb[2].mxu0 }
 0x106   :  { %v142_v18 = vmul.f32 0.70710677, %v130_v14  ;;  %v134_v19 = vadd.f32 %v133_v17, %v59_v11  ;;  %v135_v20 = vpop.f32.mrb[3].mxu0  ;;  %v138_v27 = vmul.f32 0.5, %v130_v14 }
 0x107   :  { %v143_v21 = vmul.f32 0.70710677, %v132_v16  ;;  %v136_v22 = vadd.f32 %v135_v20, %v63_v12  ;;  %v139_v30 = vmul.f32 0.5, %v132_v16 }
 0x108   :  { %204 = verf.f32 %v142_v18  ;;  %v144_v23 = vmul.f32 0.70710677, %v134_v19  ;;  %v140_v34 = vmul.f32 0.5, %v134_v19 }
 0x109   :  { %206 = verf.f32 %v143_v21  ;;  %v145_v24 = vmul.f32 0.70710677, %v136_v22  ;;  %v141_v37 = vmul.f32 0.5, %v136_v22 }
 0x10a   :  { %208 = verf.f32 %v144_v23 }
 0x10b   :  { %210 = verf.f32 %v145_v24 }
 0x112   :  { %v205_v25 = vpop.eup %204 }
 0x113   :  { %v207_v26 = vpop.eup %206  ;;  %v150_v28 = vadd.f32 1.0, %v205_v25 }
 0x114   :  { %v209_v29 = vpop.eup %208  ;;  %v151_v31 = vadd.f32 1.0, %v207_v26 }
 0x115   :  { %v211_v32 = vpop.eup %210  ;;  %v154_v33 = vmul.f32 %v150_v28, %v138_v27  ;;  %v152_v35 = vadd.f32 1.0, %v209_v29 }
 0x116   :  { %v155_v36 = vmul.f32 %v151_v31, %v139_v30  ;;  %v153_v38 = vadd.f32 1.0, %v211_v32 }
 0x117   :  { %158 = vst [vmem:[#allocation7] sm:$0xff] %v154_v33  ;;  %v156_v39 = vmul.f32 %v152_v35, %v140_v34 }
 0x118   :  { %159 = vst [vmem:[#allocation7 + $0x8] sm:$0xff] %v155_v36  ;;  %v157_v40 = vmul.f32 %v153_v38, %v141_v37 }
 0x119   :  { %160 = vst [vmem:[#allocation7 + $0x10] sm:$0xff] %v156_v39 }
 0x11a   :  { %161 = vst [vmem:[#allocation7 + $0x18] sm:$0xff] %v157_v40 }
 0x11b   :  { %267 = shalt.err (!%p264_p6)
}
 0x11c   :  { %s268_s17 = scalar_lea.hbm %s356_s3, 512 }
 0x11d   :  { %p269_p7 = scmp.ne.s32.totalorder %s356_s3, %s268_s17  ;;  %p272_p8 = scmp.lt.u32.totalorder %s268_s17, %s356_s3 }
 0x11f   :  { %p274_p9 = pnand %p272_p8, %p269_p7 }
 0x121   :  { %277 = shalt.err (!%p274_p9)
}
 0x122   :  { %s292_s22 = smov 256   ;;  %s293_s23 = smov 16  }
 0x123   :  { %173 = dma.vmem_to_hbm [thread:$0]  %s168_s13, 512, %s356_s3, [#allocation4], %s292_s22, %s292_s22, %s293_s23  }
 0x124   :  { %282 = dma.done.wait [#allocation4], 512  }
 0x125   :  { %283 = vsyncadd [#allocation4], 4294966784 }
 0x126   :  { %177 = vsyncpa [#allocation3], 1 }
 0x127   :  { %178 = vsyncpa [#allocation6], 1 }
 0x128   :  { %179 = vsyncpa [#allocation4], 1 }

</bundles_post_ra>
